<compile_context>
chip_gen: v5e
topology: v5e:2x2
jax: 0.10.0
libtpu: 0.0.40
codegen_flags: <defaults>
</compile_context>

<pallas_src>
import functools

import jax
import jax.numpy as jnp
from jax.experimental import pallas as pl
from jax.experimental.pallas import tpu as pltpu

LANE = 128
SUBLANE = 8


def _round_up(x, m):
    return (x + m - 1) // m * m


def _pad2d(x, rows, cols):
    r, c = x.shape
    return jnp.pad(x, ((0, rows - r), (0, cols - c)))


def fused_gcn_kernel(a_ref, x_ref, w1_ref, b1_ref, w2_ref, b2_ref,
                     o_ref, xw1_ref, h_ref, *, tm):
    """Two fused GCN layers. grid = (stage, row_tile)."""
    s = pl.program_id(0)   # stage
    i = pl.program_id(1)   # row tile

    # X @ W1 is shared by every stage-0 row tile: compute it exactly once.
    @pl.when(jnp.logical_and(s == 0, i == 0))
    def _():
        xw1 = jnp.dot(x_ref[...], w1_ref[...],
                      preferred_element_type=jnp.float32)
        xw1_ref[...] = xw1.astype(xw1_ref.dtype)

    @pl.when(s == 0)
    def _():
        # Layer 1 row tile: H[i*tm:(i+1)*tm] = relu(A[i,:] @ XW1 + b1)
        agg = jnp.dot(a_ref[...], xw1_ref[...],
                      preferred_element_type=jnp.float32)
        h = jnp.maximum(agg + b1_ref[...], 0.0)
        row = pl.multiple_of(i * tm, tm)
        h_ref[pl.ds(row, tm), :] = h.astype(h_ref.dtype)

    @pl.when(s == 1)
    def _():
        # Layer 2 row tile: OUT[i] = (A[i,:] @ H) @ W2 + b2
        ah = jnp.dot(a_ref[...], h_ref[...],
                     preferred_element_type=jnp.float32)
        out = jnp.dot(ah.astype(jnp.bfloat16), w2_ref[...],
                      preferred_element_type=jnp.float32) + b2_ref[...]
        o_ref[...] = out.astype(o_ref.dtype)


def fused_gcn_forward(a_pad, x_pad, w1_p, b1_p, w2_p, b2_p):
    """a_pad: [Np,Np] bf16; x_pad: [Np,Fe] bf16; w*: bf16; b*: f32 [1,F]."""
    n_pad = a_pad.shape[0]
    fe = x_pad.shape[1]
    fh = w1_p.shape[1]
    fo = w2_p.shape[1]

    # Whole problem in one row tile if small, else 256-row panels (v7x-safe).
    tm = n_pad if n_pad <= 256 else 256
    assert n_pad % tm == 0
    nt = n_pad // tm

    kernel = functools.partial(fused_gcn_kernel, tm=tm)

    flops = (2 * n_pad * fe * fh            # X @ W1
             + 2 * n_pad * n_pad * fh       # A @ XW1
             + 2 * n_pad * n_pad * fh       # A @ H
             + 2 * n_pad * fh * fo)         # (A H) @ W2
    bytes_accessed = (2 * a_pad.size * 2 + x_pad.size * 2
                      + w1_p.size * 2 + w2_p.size * 2
                      + (b1_p.size + b2_p.size) * 4
                      + n_pad * fo * 4)

    vmem_bytes = (2 * tm * n_pad * 2        # A row panel (double buffered, bf16)
                  + n_pad * fe * 2          # X (resident)
                  + fe * fh * 2 + fh * fo * 2
                  + 2 * SUBLANE * (fh + fo) * 4
                  + 2 * n_pad * fh * 2      # xw1 + h scratch
                  + 2 * tm * fo * 4)        # output block (double buffered, f32)
    vmem_limit = int(min(64 * 1024 * 1024, max(4 * 1024 * 1024, 2 * vmem_bytes)))

    return pl.pallas_call(
        kernel,
        out_shape=jax.ShapeDtypeStruct((n_pad, fo), jnp.float32),
        grid_spec=pltpu.PrefetchScalarGridSpec(
            num_scalar_prefetch=0,
            grid=(2, nt),
            in_specs=[
                pl.BlockSpec((tm, n_pad), lambda s, i: (i, 0)),   # A row panel
                pl.BlockSpec((n_pad, fe), lambda s, i: (0, 0)),   # X (resident)
                pl.BlockSpec((fe, fh), lambda s, i: (0, 0)),      # W1 (resident)
                pl.BlockSpec((1, fh), lambda s, i: (0, 0)),       # b1 (resident)
                pl.BlockSpec((fh, fo), lambda s, i: (0, 0)),      # W2 (resident)
                pl.BlockSpec((1, fo), lambda s, i: (0, 0)),       # b2 (resident)
            ],
            # Stage 0 never writes the output; park it on block 0 (i*s == 0) so
            # no garbage write-back happens; stage 1 walks the real row tiles.
            out_specs=pl.BlockSpec((tm, fo), lambda s, i: (i * s, 0)),
            scratch_shapes=[
                pltpu.VMEM((n_pad, fh), jnp.bfloat16),   # X @ W1
                pltpu.VMEM((n_pad, fh), jnp.bfloat16),   # H = relu(A @ XW1 + b1)
            ],
        ),
        compiler_params=pltpu.CompilerParams(
            # Stage 1 consumes the H scratch written by *all* stage-0 tiles, so
            # neither axis may be sharded across TensorCores.
            dimension_semantics=("arbitrary", "arbitrary"),
            vmem_limit_bytes=vmem_limit,
        ),
        cost_estimate=pl.CostEstimate(flops=flops, transcendentals=0,
                                      bytes_accessed=bytes_accessed),
    )(a_pad, x_pad, w1_p, b1_p, w2_p, b2_p)


def build_normalized_adjacency(edge_index, num_graph_nodes):
    """Dense D^{-1/2} (A + I) D^{-1/2}, matching PyG GCNConv defaults.
    Uses scatter-add so duplicate edges are counted (message-passing semantics)."""
    src, dst = edge_index[0], edge_index[1]
    a = jnp.zeros((num_graph_nodes, num_graph_nodes), jnp.float32)
    a = a.at[dst, src].add(1.0)                             # message src -> dst
    a = a + jnp.eye(num_graph_nodes, dtype=jnp.float32)     # self loops
    deg = jnp.sum(a, axis=1)
    d_inv_sqrt = jnp.where(deg > 0, 1.0 / jnp.sqrt(deg), 0.0)
    return d_inv_sqrt[:, None] * a * d_inv_sqrt[None, :]


def prepare_graph(edge_index, num_graph_nodes):
    """One-time per-graph preprocessing (hoisted out of the forward path)."""
    n_pad = _round_up(max(num_graph_nodes, SUBLANE), SUBLANE)
    tm = n_pad if n_pad <= 256 else 256
    if n_pad % tm:
        n_pad = _round_up(n_pad, tm)
    a = build_normalized_adjacency(edge_index, num_graph_nodes)
    return _pad2d(a, n_pad, n_pad).astype(jnp.bfloat16), n_pad


def prepare_params(params):
    """One-time weight padding to 128-lane multiples + bf16 cast."""
    fe = _round_up(params["w1"].shape[0], LANE)
    fh = _round_up(params["w1"].shape[1], LANE)
    fo = _round_up(params["w2"].shape[1], LANE)
    return {
        "w1": _pad2d(params["w1"], fe, fh).astype(jnp.bfloat16),
        "b1": _pad2d(params["b1"], 1, fh).astype(jnp.float32),
        "w2": _pad2d(params["w2"], fh, fo).astype(jnp.bfloat16),
        "b2": _pad2d(params["b2"], 1, fo).astype(jnp.float32),
        "fe": fe,
    }


def glorot(key, shape):
    fan_in, fan_out = shape
    limit = jnp.sqrt(6.0 / (fan_in + fan_out))
    return jax.random.uniform(key, shape, jnp.float32, -limit, limit)


def init_params(key, num_nodes, embedding_dim, hidden_dim, output_dim):
    k_emb, k_w1, k_w2 = jax.random.split(key, 3)
    return {
        "embedding": jax.random.normal(k_emb, (num_nodes, embedding_dim), jnp.float32),
        "w1": glorot(k_w1, (embedding_dim, hidden_dim)),
        "b1": jnp.zeros((1, hidden_dim), jnp.float32),
        "w2": glorot(k_w2, (hidden_dim, output_dim)),
        "b2": jnp.zeros((1, output_dim), jnp.float32),
    }


def graph_embedding_forward(params, padded, node_ids, a_pad, n_pad):
    """Forward pass of GraphEmbeddingModel (uses precomputed a_pad / padded weights)."""
    n = node_ids.shape[0]
    out_dim = params["w2"].shape[1]
    # TODO(synk): embedding gather stays as plain-XLA glue; fusing it via
    # scalar-prefetch row gather is possible but not worth it at [N, F] = [16, 16].
    x = jnp.take(params["embedding"], node_ids, axis=0)
    x_pad = _pad2d(x, n_pad, padded["fe"]).astype(jnp.bfloat16)
    out = fused_gcn_forward(a_pad, x_pad, padded["w1"], padded["b1"],
                            padded["w2"], padded["b2"])
    return out[:n, :out_dim]


if __name__ == "__main__":
    num_nodes = 16       # embedding vocabulary size (== number of graph nodes here)
    embedding_dim = 16
    hidden_dim = 32
    output_dim = 8
    n_graph_nodes = 16

    key = jax.random.PRNGKey(0)
    params = init_params(key, num_nodes, embedding_dim, hidden_dim, output_dim)

    # data.x: node indices into the embedding table.
    node_ids = jnp.arange(n_graph_nodes, dtype=jnp.int32)

    # data.edge_index: a small undirected ring graph, both directions listed.
    src = jnp.arange(n_graph_nodes, dtype=jnp.int32)
    dst = (src + 1) % n_graph_nodes
    edge_index = jnp.stack(
        [jnp.concatenate([src, dst]), jnp.concatenate([dst, src])], axis=0)

    # One-time per-graph / per-model preprocessing (hoisted out of the hot path).
    a_pad, n_pad = prepare_graph(edge_index, n_graph_nodes)
    padded = prepare_params(params)

    out = graph_embedding_forward(params, padded, node_ids, a_pad, n_pad)
    out = jax.block_until_ready(out)
    assert out.shape == (n_graph_nodes, output_dim)

    # Pure-JAX reference (f32 math on the same bf16-rounded inputs).
    bf = lambda t: t.astype(jnp.bfloat16).astype(jnp.float32)
    a_f = bf(build_normalized_adjacency(edge_index, n_graph_nodes))
    x_f = bf(jnp.take(params["embedding"], node_ids, axis=0))
    h_f = jnp.maximum(a_f @ (x_f @ bf(params["w1"])) + params["b1"], 0.0)
    ref_out = a_f @ (h_f @ bf(params["w2"])) + params["b2"]
    max_err = float(jnp.max(jnp.abs(out - ref_out)))
    assert max_err < 0.1, f"kernel/reference mismatch: {max_err}"

    print("KERNEL_OK")
</pallas_src>

<mosaic_0001>
module attributes {stable_mosaic.version = 11 : i64} {
  func.func @fused_gcn_kernel(%arg0: i32, %arg1: i32, %arg2: memref<16x16xbf16, #tpu.memory_space<vmem>>, %arg3: memref<16x128xbf16, #tpu.memory_space<vmem>>, %arg4: memref<128x128xbf16, #tpu.memory_space<vmem>>, %arg5: memref<1x128xf32, #tpu.memory_space<vmem>>, %arg6: memref<128x128xbf16, #tpu.memory_space<vmem>>, %arg7: memref<1x128xf32, #tpu.memory_space<vmem>>, %arg8: memref<16x128xf32, #tpu.memory_space<vmem>>, %arg9: memref<16x128xbf16, #tpu.memory_space<vmem>>, %arg10: memref<16x128xbf16, #tpu.memory_space<vmem>>) attributes {dimension_semantics = [#tpu.dimension_semantics<arbitrary>, #tpu.dimension_semantics<arbitrary>], iteration_bounds = array<i64: 2, 1>, scalar_prefetch = 0 : i64, scratch_operands = 2 : i64, tpu.core_type = #tpu.core_type<tc>, window_params = [{transform_indices = @transform_0, window_bounds = array<i64: 16, 16>}, {pipeline_mode = #tpu.pipeline_mode<synchronous>, transform_indices = @transform_1, window_bounds = array<i64: 16, 128>}, {pipeline_mode = #tpu.pipeline_mode<synchronous>, transform_indices = @transform_2, window_bounds = array<i64: 128, 128>}, {pipeline_mode = #tpu.pipeline_mode<synchronous>, transform_indices = @transform_3, window_bounds = array<i64: 1, 128>}, {pipeline_mode = #tpu.pipeline_mode<synchronous>, transform_indices = @transform_4, window_bounds = array<i64: 128, 128>}, {pipeline_mode = #tpu.pipeline_mode<synchronous>, transform_indices = @transform_5, window_bounds = array<i64: 1, 128>}, {transform_indices = @transform_6, window_bounds = array<i64: 16, 128>}]} {
    %c0_i32 = arith.constant 0 : i32
    %0 = arith.cmpi eq, %arg0, %c0_i32 : i32
    %c0_i32_0 = arith.constant 0 : i32
    %1 = arith.cmpi eq, %arg1, %c0_i32_0 : i32
    %2 = arith.andi %0, %1 : i1
    %3 = arith.extui %2 : i1 to i32
    %c0_i32_1 = arith.constant 0 : i32
    %4 = arith.cmpi ne, %3, %c0_i32_1 : i32
    scf.if %4 {
      %c0 = arith.constant 0 : index
      %c0_5 = arith.constant 0 : index
      %11 = vector.load %arg3[%c0, %c0_5] : memref<16x128xbf16, #tpu.memory_space<vmem>>, vector<16x128xbf16>
      %c0_6 = arith.constant 0 : index
      %c0_7 = arith.constant 0 : index
      %12 = vector.load %arg4[%c0_6, %c0_7] : memref<128x128xbf16, #tpu.memory_space<vmem>>, vector<128x128xbf16>
      %cst = arith.constant dense<0.000000e+00> : vector<16x128xf32>
      %13 = tpu.matmul %11, %12, %cst {dimension_numbers = #tpu.dot_dimension_numbers<[1], [0], [0], [1], [0, 0, 1, 1], [], []>} : vector<16x128xbf16>, vector<128x128xbf16>, vector<16x128xf32> -> vector<16x128xf32>
      %14 = arith.truncf %13 : vector<16x128xf32> to vector<16x128xbf16>
      %c0_8 = arith.constant 0 : index
      %c0_9 = arith.constant 0 : index
      %15 = vector.load %arg9[%c0_8, %c0_9] : memref<16x128xbf16, #tpu.memory_space<vmem>>, vector<16x128xbf16>
      tpu.vector_store %arg9[%c0_8, %c0_9], %14 {strides = array<i32>} : memref<16x128xbf16, #tpu.memory_space<vmem>>, vector<16x128xbf16>,
    } else {
    }
    %c0_i32_2 = arith.constant 0 : i32
    %5 = arith.cmpi eq, %arg0, %c0_i32_2 : i32
    %6 = arith.extui %5 : i1 to i32
    %c0_i32_3 = arith.constant 0 : i32
    %7 = arith.cmpi ne, %6, %c0_i32_3 : i32
    scf.if %7 {
      %c0 = arith.constant 0 : index
      %c0_5 = arith.constant 0 : index
      %11 = vector.load %arg2[%c0, %c0_5] : memref<16x16xbf16, #tpu.memory_space<vmem>>, vector<16x16xbf16>
      %c0_6 = arith.constant 0 : index
      %c0_7 = arith.constant 0 : index
      %12 = vector.load %arg9[%c0_6, %c0_7] : memref<16x128xbf16, #tpu.memory_space<vmem>>, vector<16x128xbf16>
      %cst = arith.constant dense<0.000000e+00> : vector<16x128xf32>
      %13 = tpu.matmul %11, %12, %cst {dimension_numbers = #tpu.dot_dimension_numbers<[1], [0], [0], [1], [0, 0, 1, 1], [], []>} : vector<16x16xbf16>, vector<16x128xbf16>, vector<16x128xf32> -> vector<16x128xf32>
      %c0_8 = arith.constant 0 : index
      %c0_9 = arith.constant 0 : index
      %14 = vector.load %arg5[%c0_8, %c0_9] : memref<1x128xf32, #tpu.memory_space<vmem>>, vector<1x128xf32>
      %15 = vector.broadcast %14 : vector<1x128xf32> to vector<16x128xf32>
      %16 = arith.addf %13, %15 : vector<16x128xf32>
      %cst_10 = arith.constant 0.000000e+00 : f32
      %17 = vector.broadcast %cst_10 : f32 to vector<16x128xf32>
      %18 = arith.maximumf %16, %17 : vector<16x128xf32>
      %c16_i32 = arith.constant 16 : i32
      %19 = arith.muli %arg1, %c16_i32 : i32
      %20 = tpu.assume_multiple %19, 16 : i32
      %21 = arith.truncf %18 : vector<16x128xf32> to vector<16x128xbf16>
      %22 = arith.index_cast %20 : i32 to index
      %c0_11 = arith.constant 0 : index
      %23 = vector.load %arg10[%22, %c0_11] : memref<16x128xbf16, #tpu.memory_space<vmem>>, vector<16x128xbf16>
      tpu.vector_store %arg10[%22, %c0_11], %21 {strides = array<i32>} : memref<16x128xbf16, #tpu.memory_space<vmem>>, vector<16x128xbf16>,
    } else {
    }
    %c1_i32 = arith.constant 1 : i32
    %8 = arith.cmpi eq, %arg0, %c1_i32 : i32
    %9 = arith.extui %8 : i1 to i32
    %c0_i32_4 = arith.constant 0 : i32
    %10 = arith.cmpi ne, %9, %c0_i32_4 : i32
    scf.if %10 {
      %c0 = arith.constant 0 : index
      %c0_5 = arith.constant 0 : index
      %11 = vector.load %arg2[%c0, %c0_5] : memref<16x16xbf16, #tpu.memory_space<vmem>>, vector<16x16xbf16>
      %c0_6 = arith.constant 0 : index
      %c0_7 = arith.constant 0 : index
      %12 = vector.load %arg10[%c0_6, %c0_7] : memref<16x128xbf16, #tpu.memory_space<vmem>>, vector<16x128xbf16>
      %cst = arith.constant dense<0.000000e+00> : vector<16x128xf32>
      %13 = tpu.matmul %11, %12, %cst {dimension_numbers = #tpu.dot_dimension_numbers<[1], [0], [0], [1], [0, 0, 1, 1], [], []>} : vector<16x16xbf16>, vector<16x128xbf16>, vector<16x128xf32> -> vector<16x128xf32>
      %14 = arith.truncf %13 : vector<16x128xf32> to vector<16x128xbf16>
      %c0_8 = arith.constant 0 : index
      %c0_9 = arith.constant 0 : index
      %15 = vector.load %arg6[%c0_8, %c0_9] : memref<128x128xbf16, #tpu.memory_space<vmem>>, vector<128x128xbf16>
      %cst_10 = arith.constant dense<0.000000e+00> : vector<16x128xf32>
      %16 = tpu.matmul %14, %15, %cst_10 {dimension_numbers = #tpu.dot_dimension_numbers<[1], [0], [0], [1], [0, 0, 1, 1], [], []>} : vector<16x128xbf16>, vector<128x128xbf16>, vector<16x128xf32> -> vector<16x128xf32>
      %c0_11 = arith.constant 0 : index
      %c0_12 = arith.constant 0 : index
      %17 = vector.load %arg7[%c0_11, %c0_12] : memref<1x128xf32, #tpu.memory_space<vmem>>, vector<1x128xf32>
      %18 = vector.broadcast %17 : vector<1x128xf32> to vector<16x128xf32>
      %19 = arith.addf %16, %18 : vector<16x128xf32>
      %c0_13 = arith.constant 0 : index
      %c0_14 = arith.constant 0 : index
      %20 = vector.load %arg8[%c0_13, %c0_14] : memref<16x128xf32, #tpu.memory_space<vmem>>, vector<16x128xf32>
      tpu.vector_store %arg8[%c0_13, %c0_14], %19 {strides = array<i32>} : memref<16x128xf32, #tpu.memory_space<vmem>>, vector<16x128xf32>,
    } else {
    }
    return
  }
  func.func @transform_0(%arg0: i32, %arg1: i32) -> (i32, i32) {
    %c0_i32 = arith.constant 0 : i32
    %c0_i32_0 = arith.constant 0 : i32
    return %arg1, %c0_i32 : i32, i32
  }
  func.func @transform_1(%arg0: i32, %arg1: i32) -> (i32, i32) {
    %c0_i32 = arith.constant 0 : i32
    %c0_i32_0 = arith.constant 0 : i32
    %c0_i32_1 = arith.constant 0 : i32
    return %c0_i32, %c0_i32_0 : i32, i32
  }
  func.func @transform_2(%arg0: i32, %arg1: i32) -> (i32, i32) {
    %c0_i32 = arith.constant 0 : i32
    %c0_i32_0 = arith.constant 0 : i32
    %c0_i32_1 = arith.constant 0 : i32
    return %c0_i32, %c0_i32_0 : i32, i32
  }
  func.func @transform_3(%arg0: i32, %arg1: i32) -> (i32, i32) {
    %c0_i32 = arith.constant 0 : i32
    %c0_i32_0 = arith.constant 0 : i32
    %c0_i32_1 = arith.constant 0 : i32
    return %c0_i32, %c0_i32_0 : i32, i32
  }
  func.func @transform_4(%arg0: i32, %arg1: i32) -> (i32, i32) {
    %c0_i32 = arith.constant 0 : i32
    %c0_i32_0 = arith.constant 0 : i32
    %c0_i32_1 = arith.constant 0 : i32
    return %c0_i32, %c0_i32_0 : i32, i32
  }
  func.func @transform_5(%arg0: i32, %arg1: i32) -> (i32, i32) {
    %c0_i32 = arith.constant 0 : i32
    %c0_i32_0 = arith.constant 0 : i32
    %c0_i32_1 = arith.constant 0 : i32
    return %c0_i32, %c0_i32_0 : i32, i32
  }
  func.func @transform_6(%arg0: i32, %arg1: i32) -> (i32, i32) {
    %0 = arith.muli %arg1, %arg0 : i32
    %c0_i32 = arith.constant 0 : i32
    %c0_i32_0 = arith.constant 0 : i32
    return %0, %c0_i32 : i32, i32
  }
}

</mosaic_0001>

<bundles_post_ra>
// kernel: tpu_custom_call.1
= control target key start
LH: loop header
LB: loop body
LE: loop exit
PB: predicated region body
PF: predicated region fallthrough
CT: control target
= control target key end

     0   :  { %11 = vsyncpa [#allocation5], 0  ;;  %s1264_s0 = inlined_call_operand.hbm [shape: bf16[16,16], index: 0, kind: input, shape index: {}]   ;;  %s1265_s1 = inlined_call_operand.hbm [shape: bf16[16,128], index: 1, kind: input, shape index: {}]   ;;  %s1266_s2 = inlined_call_operand.hbm [shape: bf16[128,128], index: 2, kind: input, shape index: {}]   ;;  %s1267_s3 = inlined_call_operand.vmem [shape: f32[1,128], index: 3, kind: input, shape index: {}]   ;;  %s1268_s4 = inlined_call_operand.hbm [shape: bf16[128,128], index: 4, kind: input, shape index: {}]   ;;  %s1269_s5 = inlined_call_operand.vmem [shape: f32[1,128], index: 5, kind: input, shape index: {}]   ;;  %s1270_s6 = inlined_call_operand.hbm [shape: f32[16,128], index: 6, kind: output, shape index: {}]  }
   0x1   :  { %12 = vsyncpa [#allocation8], 0 }
   0x2   :  { %13 = vsyncpa [#allocation11], 0 }
   0x3   :  { %14 = vsyncpa [#allocation6], 0 }
   0x4   :  { %16 = vsyncpa [#allocation6 + $0x1], 0  ;;  %s1164_s21 = smov 0   ;;  %s1166_s22 = smov 0  }
   0x5   :  { %s1168_s23 = smov 0  }
   0x6 LB: > { %s712_s24 = sadd.s32 4294967295, %s1118_s23   ;;  %s713_s25 = sadd.s32 4294967294, %s1118_s23   ;;  %s1118_s23 = sphi %s1168_s23, %s22_s23   ;;  %s1114_s22 = sphi %s1166_s22, %s1275_s22   ;;  %s1110_s21 = sphi %s1164_s21, %s1274_s21  }
   0x7   : > { %p714_p0 = scmp.ge.s32.totalorder %s1118_s23, 1  ;;  %p198_p1 = scmp.lt.s32.totalorder %s1118_s23, 3 }
   0x8   : > { %p1185_p2 = scmp.eq.s32.totalorder %s712_s24, 0  ;;  %s226_s30 = sshll.u32 %s1265_s1, 4  ;;  %s227_s30 = int_to_ptr.hbm [resolvable:$true] %s226_s30 }
   0x9   : > { %p1189_p3 = pnand %p714_p0, %p198_p1  ;;  %s1120_s7 = smov [#allocation7]  }
   0xa   : > { %s228_s8 = sshll.u32 %s1120_s7, 4  ;;  %s34_s10 = sadd.s32 1, %s1114_s22  ;;  %s229_s8 = int_to_ptr.vmem [resolvable:$true] %s228_s8 }
   0xb   : > { %p869_p4 = pneg %p1189_p3  ;;  %s1121_s11 = smov 64  }
   0xc   : > { %s1122_s12 = smov 4   ;;  %p36_p6 = scmp.ge.s32.totalorder %s34_s10, 2 }
   0xd   : > { %p1200_p5 = pnand %p1185_p2, %p869_p4  ;;  %s212_s15 = sshll.u32 %s1264_s0, 4  ;;  %s213_s15 = int_to_ptr.hbm [resolvable:$true] %s212_s15 }
   0xe   : > { %s1277_s10 = smov (%p36_p6, %s34_s10), 0  ;;  %s1123_s16 = smov [#allocation4]  }
   0xf   : > { %875 = dma.hbm_to_vmem [thread:$0]  (!%p1200_p5), %s227_s30, 128, %s229_s8, [#allocation8], %s1121_s11, %s1121_s11, %s1122_s12  }
  0x10   : > { %s214_s17 = sshll.u32 %s1123_s16, 4  ;;  %s240_s20 = sshll.u32 %s1266_s2, 4  ;;  %s215_s17 = int_to_ptr.vmem [resolvable:$true] %s214_s17  ;;  %s241_s20 = int_to_ptr.hbm [resolvable:$true] %s240_s20 }
  0x11   : > { %872 = dma.hbm_to_vmem [thread:$0]  (!%p1200_p5), %s213_s15, 128, %s215_s17, [#allocation5], %s1121_s11, %s1121_s11, %s1122_s12  }
  0x12   : > { %s257_s30 = sshll.u32 %s1268_s4, 4  ;;  %s1124_s7 = smov [#allocation9]   ;;  %s258_s30 = int_to_ptr.hbm [resolvable:$true] %s257_s30 }
  0x13   : > { %s242_s8 = sshll.u32 %s1124_s7, 4  ;;  %s1125_s13 = smov [#allocation10]   ;;  %s243_s8 = int_to_ptr.vmem [resolvable:$true] %s242_s8 }
  0x14   : > { %878 = dma.hbm_to_vmem [thread:$0]  (!%p1200_p5), %s241_s20, 1024, %s243_s8, [#allocation8], %s1121_s11, %s1121_s11, %s1122_s12  }
  0x15   : > { %s259_s14 = sshll.u32 %s1125_s13, 4  ;;  %278 = sbr.rel (%p1189_p3) target bundleno = 641 (0x281), region = 44  ;;  %s260_s14 = int_to_ptr.vmem [resolvable:$true] %s259_s14 }
  0x16   : > { %881 = dma.hbm_to_vmem [thread:$0]  (!%p1200_p5), %s258_s30, 1024, %s260_s14, [#allocation11], %s1121_s11, %s1121_s11, %s1122_s12  }
  0x1a   : > { %1093 = dma.done.wait (%p1185_p2), [#allocation5], 128  }
  0x1b   : > { %1095 = vsyncadd (%p1185_p2), [#allocation5], 4294967168 }
  0x1c   : > { %1097 = dma.done.wait (%p1185_p2), [#allocation8], 1152  }
  0x1d   : > { %1099 = vsyncadd (%p1185_p2), [#allocation8], 4294966144 }
  0x1e   : > { %1101 = dma.done.wait (%p1185_p2), [#allocation11], 1024  }
  0x1f   : > { %1103 = vsyncadd (%p1185_p2), [#allocation11], 4294966272  ;;  %p323_p7 = scmp.eq.s32.totalorder %s1110_s21, 0 }
  0x20   : > { %v826_v0 = vld [vmem:[#allocation9 + $0x38] sm:$0xff] (%p323_p7)  ;;  %v825_v1 = vld [vmem:[#allocation9 + $0x30] sm:$0xff] (%p323_p7)  ;;  %v824_v2 = vld [vmem:[#allocation9 + $0x28] sm:$0xff] (%p323_p7) }
  0x21   : > { %328 = sbr.rel (!%p323_p7) target bundleno = 201 (0xc9), region = 64  ;;  %401 = vmatpush.bf16.msra.mxu0 (%p323_p7), %v826_v0  ;;  %v823_v3 = vld [vmem:[#allocation9 + $0x20] sm:$0xff] (%p323_p7)  ;;  %v822_v4 = vld [vmem:[#allocation9 + $0x18] sm:$0xff] (%p323_p7)  ;;  %v821_v5 = vld [vmem:[#allocation9 + $0x10] sm:$0xff] (%p323_p7) }
  0x22   : > { %v820_v6 = vld [vmem:[#allocation9 + $0x8] sm:$0xff] (%p323_p7)  ;;  %v819_v7 = vld [vmem:[#allocation9] sm:$0xff] (%p323_p7)  ;;  %v818_v8 = vld [vmem:[#allocation7] sm:$0xff] (%p323_p7) }
  0x25   : > { %402 = vmatpush.bf16.msra.mxu0 (%p323_p7), %v825_v1 }
  0x29   : > { %403 = vmatpush.bf16.msra.mxu0 %v824_v2 }
  0x2d   : > { %404 = vmatpush.bf16.msra.mxu0 %v823_v3 }
  0x31   : > { %405 = vmatpush.bf16.msra.mxu0 %v822_v4 }
  0x35   : > { %406 = vmatpush.bf16.msra.mxu0 %v821_v5 }
  0x39   : > { %407 = vmatpush.bf16.msra.mxu0 %v820_v6 }
  0x3d   : > { %408 = vmatpush.bf16.msra.mxu0 %v819_v7 }
  0x40   : > { %409 = vmatmul.bf16.vlgmr.msra.gmra.mxu0 %v818_v8 }
  0xbd   : > { %v410_v9 = vpop.f32.mrf.mxu0 }
  0xc5   : > { %v412_v10 = vpop.f32.mrf.mxu0 }
  0xc6   : > { %v842_v11 = vpack.c.bf16 %v412_v10, %v410_v9 }
  0xc8   : > { %843 = vst [vmem:[#allocation2] sm:$0xff] %v842_v11  }
  0xc9 PF: > { %p761_p8 = scmp.ne.s32.totalorder %s1110_s21, 0 }
  0xcb   : > { %421 = sbr.rel (%p761_p8) target bundleno = 353 (0x161), region = 68 }
  0xd0   : > { %v828_v12 = vld [vmem:[#allocation2] sm:$0xff]  ;;  %v827_v13 = vld [vmem:[#allocation4] sm:$0xff]  ;;  %vm441_vm0 = vcmask 130048  }
  0xd1   : > { %452 = vmatpush.bf16.msra.mxu0 %v828_v12  ;;  %v930_v15 = vld [vmem:[%s1267_s3] ss:$0 sm:$0xff] }
  0xd4   : > { %770 = vmatmul.msk.bf16.vlgmr.msra.gmra.mxu0 %vm441_vm0, %v827_v13 }
 0x151   : > { %v454_v14 = vpop.f32.mrf.mxu0 }
 0x152   : > { %v455_v16 = vadd.f32 %v930_v15, %v454_v14 }
 0x154   : > { %v459_v19 = vmax.f32 %v455_v16, 0.0 }
 0x159   : > { %v456_v17 = vpop.f32.mrf.mxu0 }
 0x15a   : > { %v457_v18 = vadd.f32 %v930_v15, %v456_v17 }
 0x15c   : > { %v460_v20 = vmax.f32 %v457_v18, 0.0 }
 0x15e   : > { %v847_v21 = vpack.c.bf16 %v460_v20, %v459_v19 }
 0x160   : > { %848 = vst [vmem:[#allocation3] sm:$0xff] %v847_v21  }
 0x161 PF: > { %p771_p9 = scmp.ne.s32.totalorder %s1110_s21, 1 }
 0x163   : > { %473 = sbr.rel (%p771_p9) target bundleno = 637 (0x27d), region = 72 }
 0x168   : > { %v830_v22 = vld [vmem:[#allocation3] sm:$0xff]  ;;  %v838_v23 = vld [vmem:[#allocation10 + $0x38] sm:$0xff]  ;;  %v829_v24 = vld [vmem:[#allocation4] sm:$0xff]  ;;  %vm489_vm1 = vcmask 130048  }
 0x169   : > { %500 = vmatpush.bf16.msra.mxu0 %v830_v22  ;;  %576 = vmatpush.bf16.msra.mxu1 %v838_v23  ;;  %v837_v25 = vld [vmem:[#allocation10 + $0x30] sm:$0xff]  ;;  %v836_v26 = vld [vmem:[#allocation10 + $0x28] sm:$0xff]  ;;  %v835_v27 = vld [vmem:[#allocation10 + $0x20] sm:$0xff] }
 0x16a   : > { %v834_v28 = vld [vmem:[#allocation10 + $0x18] sm:$0xff]  ;;  %v833_v29 = vld [vmem:[#allocation10 + $0x10] sm:$0xff]  ;;  %v832_v30 = vld [vmem:[#allocation10 + $0x8] sm:$0xff] }
 0x16b   : > { %v831_v31 = vld [vmem:[#allocation10] sm:$0xff] }
 0x16c   : > { %780 = vmatmul.msk.bf16.vlgmr.msra.gmra.mxu0 %vm489_vm1, %v829_v24  ;;  %v931_v35 = vld [vmem:[%s1269_s5] ss:$0 sm:$0xff] }
 0x16d   : > { %577 = vmatpush.bf16.msra.mxu1 %v837_v25 }
 0x171   : > { %578 = vmatpush.bf16.msra.mxu1 %v836_v26 }
 0x175   : > { %579 = vmatpush.bf16.msra.mxu1 %v835_v27 }
 0x179   : > { %580 = vmatpush.bf16.msra.mxu1 %v834_v28 }
 0x17d   : > { %581 = vmatpush.bf16.msra.mxu1 %v833_v29 }
 0x181   : > { %582 = vmatpush.bf16.msra.mxu1 %v832_v30 }
 0x185   : > { %583 = vmatpush.bf16.msra.mxu1 %v831_v31 }
 0x1e9   : > { %v502_v32 = vpop.f32.mrf.mxu0 }
 0x1f1   : > { %v504_v33 = vpop.f32.mrf.mxu0 }
 0x1f2   : > { %v507_v34 = vpack.c.bf16 %v504_v33, %v502_v32 }
 0x1f4   : > { %584 = vmatmul.bf16.vlgmr.msra.gmra.mxu1 %v507_v34 }
 0x271   : > { %v585_v36 = vpop.f32.mrf.mxu1 }
 0x272   : > { %v586_v37 = vadd.f32 %v931_v35, %v585_v36 }
 0x274   : > { %590 = vst [vmem:[#allocation12] sm:$0xff] %v586_v37 }
 0x279   : > { %v587_v38 = vpop.f32.mrf.mxu1 }
 0x27a   : > { %v588_v39 = vadd.f32 %v931_v35, %v587_v38 }
 0x27c   : > { %591 = vst [vmem:[#allocation12 + $0x8] sm:$0xff] %v588_v39 }
 0x27d PF: > { %p894_p10 = scmp.eq.s32.totalorder %s712_s24, 1  ;;  %s608_s15 = sshll.u32 %s1270_s6, 4  ;;  %s609_s15 = int_to_ptr.hbm [resolvable:$true] %s608_s15 }
 0x27e   : > { %s1126_s16 = smov [#allocation12]   ;;  %s1127_s18 = smov 128  }
 0x27f   : > { %s606_s17 = sshll.u32 %s1126_s16, 4  ;;  %s1128_s19 = smov 8   ;;  %s607_s17 = int_to_ptr.vmem [resolvable:$true] %s606_s17 }
 0x280   : > { %866 = dma.vmem_to_hbm [thread:$0]  (%p894_p10), %s607_s17, 256, %s609_s15, [#allocation6], %s1127_s18, %s1127_s18, %s1128_s19  }
 0x281 PF: > { %p895_p11 = scmp.ge.s32.totalorder %s1118_s23, 2  ;;  %p896_p12 = scmp.eq.s32.totalorder %s713_s25, 1 }
 0x283   : > { %p883_p13 = pnand %p896_p12, %p895_p11 }
 0x285   : > { %p884_p0 = pneg %p883_p13 }
 0x287   : > { %1105 = dma.done.wait (%p884_p0), [#allocation6], 256  }
 0x288   : > { %1107 = vsyncadd (%p884_p0), [#allocation6], 4294967040  ;;  %s22_s23 = sadd.s32 1, %s1118_s23   ;;  %s1274_s21 = smov %s1114_s22 }
 0x289   : > { %p19_p1 = scmp.ge.s32.totalorder %s22_s23, 4   ;;  %s1275_s22 = smov %s1277_s10 }
 0x28b   :  { %21 = sbr.rel (!%p19_p1) target bundleno = 6 (0x6), region = 107 }
 0x290   :  { %630 = vsyncpa [#allocation5], 1 }
 0x291   :  { %632 = vsyncpa [#allocation5 + $0x1], 1 }
 0x292   :  { %633 = vsyncpa [#allocation8], 1 }
 0x293   :  { %634 = vsyncpa [#allocation11], 1 }
 0x294   :  { %635 = vsyncpa [#allocation6], 1 }
 0x295   :  { %637 = vsyncpa [#allocation6 + $0x1], 1 }

</bundles_post_ra>
